<compile_context>
chip_gen: v5e
topology: v5e:2x2
jax: 0.10.0
libtpu: 0.0.40
codegen_flags: <defaults>
</compile_context>

<pallas_src>
import jax
import jax.numpy as jnp
from jax.experimental import pallas as pl
from jax.experimental.pallas import tpu as pltpu

_LANE = 128
_SUB = 8


def _make_kernel(tr):
    """tr: tile rows per grid step (multiple of 8)."""
    folds = tr // _SUB

    def kernel(pred_ref, gt_ref, out_ref, acc_ref):
        j = pl.program_id(1)

        @pl.when(j == 0)
        def _():
            acc_ref[...] = jnp.zeros_like(acc_ref)

        p = pred_ref[0].astype(jnp.float32)          # (tr, 128)
        g = gt_ref[0].astype(jnp.float32)            # (tr, 128)

        # sigmoid via EUP exp; clamp-then-log matches the torch formulation.
        s = 1.0 / (1.0 + jnp.exp(-p))
        log_fg = jnp.log(jnp.maximum(s, 1e-8))
        log_bg = jnp.log(jnp.maximum(1.0 - s, 1e-8))
        bce = -(log_bg + g * (log_fg - log_bg))      # == -(log_fg*g + log_bg*(1-g))

        g_pos = jnp.maximum(g, 0.0)                  # dice gt_copy (smooth = 0)
        inter = g_pos * s
        denom = g_pos + s                            # gt_sum + sig_sum combined

        def fold(x):                                 # (tr,128) -> (8,128): VPU adds only
            return x.reshape(folds, _SUB, _LANE).sum(axis=0)

        acc_ref[0] += fold(bce)
        acc_ref[1] += fold(inter)
        acc_ref[2] += fold(denom)

        @pl.when(j == pl.num_programs(1) - 1)
        def _():
            out_ref[0] = acc_ref[...]                # per-batch partials -> HBM once

    return kernel


def binary_composed_loss(pred, gt, *, max_tile_rows=4096):
    """pred, gt: (B, 1, H, W) (any float dtype). Returns scalar float32 loss."""
    B, C, H, W = pred.shape
    assert C == 1 and gt.shape == pred.shape
    n = H * W
    n_pad = pl.cdiv(n, _SUB * _LANE) * (_SUB * _LANE)

    p2 = pred.reshape(B, n)
    g2 = gt.reshape(B, n)
    if n_pad != n:
        # pred=-40 -> sigmoid ~ 4e-18, gt=0: padded elements contribute ~0 to every sum.
        p2 = jnp.pad(p2, ((0, 0), (0, n_pad - n)), constant_values=-40.0)
        g2 = jnp.pad(g2, ((0, 0), (0, n_pad - n)), constant_values=0.0)

    r = n_pad // _LANE                               # rows, always a multiple of 8
    p3 = p2.reshape(B, r, _LANE)                     # keep native dtype (cast in-kernel)
    g3 = g2.reshape(B, r, _LANE)

    tr = _SUB
    for cand in (4096, 2048, 1024, 512, 256, 128, 64, 32, 16, 8):
        if cand <= max_tile_rows and r % cand == 0:
            tr = cand
            break
    n_hw = r // tr

    out = pl.pallas_call(
        _make_kernel(tr),
        out_shape=jax.ShapeDtypeStruct((B, 3, _SUB, _LANE), jnp.float32),
        grid=(B, n_hw),
        in_specs=[
            pl.BlockSpec((1, tr, _LANE), lambda b, j: (b, j, 0)),
            pl.BlockSpec((1, tr, _LANE), lambda b, j: (b, j, 0)),
        ],
        out_specs=pl.BlockSpec((1, 3, _SUB, _LANE), lambda b, j: (b, 0, 0, 0)),
        scratch_shapes=[pltpu.VMEM((3, _SUB, _LANE), jnp.float32)],
        compiler_params=pltpu.CompilerParams(
            dimension_semantics=("parallel", "arbitrary"),
            vmem_limit_bytes=32 * 1024 * 1024,       # safe on v5e/v6e/v7x
        ),
    )(p3, g3)

    # Final cross-lane reductions + scalar math on tiny (B,3,8,128) array in JAX.
    sums = out.sum(axis=(2, 3))                      # (B, 3)
    bce = jnp.minimum(sums[:, 0].sum() / (B * n) * 10.0, 100.0)
    dice_b = 1.0 - 2.0 * sums[:, 1] / jnp.maximum(sums[:, 2], 1e-8)
    return bce + dice_b.mean()


def _reference(pred, gt):
    """Pure-JAX mirror of the torch BinaryComposedLoss forward."""
    B = pred.shape[0]
    s = jax.nn.sigmoid(pred)
    log_fg = jnp.log(jnp.maximum(s, 1e-8))
    log_bg = jnp.log(jnp.maximum(1.0 - s, 1e-8))
    bce_el = -(log_fg * gt + log_bg * (1.0 - gt))
    bce = jnp.minimum(jnp.mean(bce_el) * 10.0, 100.0)

    gt_c = jnp.maximum(gt, 0.0).reshape(B, -1)
    sf = s.reshape(B, -1)
    inter = jnp.sum(gt_c * sf, axis=1)
    dice = 1.0 - 2.0 * inter / jnp.maximum(gt_c.sum(1) + sf.sum(1), 1e-8)
    return bce + jnp.mean(dice)


if __name__ == "__main__":
    key = jax.random.PRNGKey(0)
    k1, k2 = jax.random.split(key)
    B, C, H, W = 2, 1, 16, 16
    pred = jax.random.normal(k1, (B, C, H, W), dtype=jnp.float32) * 2.0
    gt = (jax.random.uniform(k2, (B, C, H, W)) > 0.5).astype(jnp.float32)

    loss = binary_composed_loss(pred, gt)
    jax.block_until_ready(loss)

    ref = _reference(pred, gt)
    assert jnp.allclose(loss, ref, rtol=1e-4, atol=1e-4), (loss, ref)

    print("KERNEL_OK")
</pallas_src>

<mosaic_0001>
module attributes {stable_mosaic.version = 11 : i64} {
  func.func @kernel(%arg0: i32, %arg1: i32, %arg2: memref<1x8x128xf32, #tpu.memory_space<vmem>>, %arg3: memref<1x8x128xf32, #tpu.memory_space<vmem>>, %arg4: memref<1x3x8x128xf32, #tpu.memory_space<vmem>>, %arg5: memref<3x8x128xf32, #tpu.memory_space<vmem>>) attributes {dimension_semantics = [#tpu.dimension_semantics<parallel>, #tpu.dimension_semantics<arbitrary>], iteration_bounds = array<i64: 2, 1>, scalar_prefetch = 0 : i64, scratch_operands = 1 : i64, tpu.core_type = #tpu.core_type<tc>, window_params = [{transform_indices = @transform_0, window_bounds = array<i64: 1, 8, 128>}, {transform_indices = @transform_1, window_bounds = array<i64: 1, 8, 128>}, {transform_indices = @transform_2, window_bounds = array<i64: 1, 3, 8, 128>}]} {
    %c0_i32 = arith.constant 0 : i32
    %0 = arith.cmpi eq, %arg1, %c0_i32 : i32
    %1 = arith.extui %0 : i1 to i32
    %c0_i32_0 = arith.constant 0 : i32
    %2 = arith.cmpi ne, %1, %c0_i32_0 : i32
    scf.if %2 {
      %cst_34 = arith.constant 0.000000e+00 : f32
      %58 = vector.broadcast %cst_34 : f32 to vector<3x8x128xf32>
      %c0_35 = arith.constant 0 : index
      %c0_36 = arith.constant 0 : index
      %c0_37 = arith.constant 0 : index
      %59 = vector.load %arg5[%c0_35, %c0_36, %c0_37] : memref<3x8x128xf32, #tpu.memory_space<vmem>>, vector<3x8x128xf32>
      tpu.vector_store %arg5[%c0_35, %c0_36, %c0_37], %58 {strides = array<i32>} : memref<3x8x128xf32, #tpu.memory_space<vmem>>, vector<3x8x128xf32>,
    } else {
    }
    %c0 = arith.constant 0 : index
    %c0_1 = arith.constant 0 : index
    %c0_2 = arith.constant 0 : index
    %3 = vector.load %arg2[%c0, %c0_1, %c0_2] : memref<1x8x128xf32, #tpu.memory_space<vmem>>, vector<1x8x128xf32>
    %4 = vector.shape_cast %3 : vector<1x8x128xf32> to vector<8x128xf32>
    %c0_3 = arith.constant 0 : index
    %c0_4 = arith.constant 0 : index
    %c0_5 = arith.constant 0 : index
    %5 = vector.load %arg3[%c0_3, %c0_4, %c0_5] : memref<1x8x128xf32, #tpu.memory_space<vmem>>, vector<1x8x128xf32>
    %6 = vector.shape_cast %5 : vector<1x8x128xf32> to vector<8x128xf32>
    %cst = arith.constant 0.000000e+00 : f32
    %7 = vector.broadcast %cst : f32 to vector<8x128xf32>
    %8 = arith.subf %7, %4 : vector<8x128xf32>
    %9 = math.exp %8 : vector<8x128xf32>
    %cst_6 = arith.constant 1.000000e+00 : f32
    %10 = vector.broadcast %cst_6 : f32 to vector<8x128xf32>
    %11 = arith.addf %10, %9 : vector<8x128xf32>
    %cst_7 = arith.constant 1.000000e+00 : f32
    %12 = vector.broadcast %cst_7 : f32 to vector<8x128xf32>
    %13 = arith.divf %12, %11 : vector<8x128xf32>
    %cst_8 = arith.constant 9.99999993E-9 : f32
    %14 = vector.broadcast %cst_8 : f32 to vector<8x128xf32>
    %15 = arith.maximumf %13, %14 : vector<8x128xf32>
    %16 = math.log %15 : vector<8x128xf32>
    %cst_9 = arith.constant 1.000000e+00 : f32
    %17 = vector.broadcast %cst_9 : f32 to vector<8x128xf32>
    %18 = arith.subf %17, %13 : vector<8x128xf32>
    %cst_10 = arith.constant 9.99999993E-9 : f32
    %19 = vector.broadcast %cst_10 : f32 to vector<8x128xf32>
    %20 = arith.maximumf %18, %19 : vector<8x128xf32>
    %21 = math.log %20 : vector<8x128xf32>
    %22 = arith.subf %16, %21 : vector<8x128xf32>
    %23 = arith.mulf %6, %22 : vector<8x128xf32>
    %24 = arith.addf %21, %23 : vector<8x128xf32>
    %cst_11 = arith.constant 0.000000e+00 : f32
    %25 = vector.broadcast %cst_11 : f32 to vector<8x128xf32>
    %26 = arith.subf %25, %24 : vector<8x128xf32>
    %cst_12 = arith.constant 0.000000e+00 : f32
    %27 = vector.broadcast %cst_12 : f32 to vector<8x128xf32>
    %28 = arith.maximumf %6, %27 : vector<8x128xf32>
    %29 = arith.mulf %28, %13 : vector<8x128xf32>
    %30 = arith.addf %28, %13 : vector<8x128xf32>
    %c0_13 = arith.constant 0 : index
    %c0_14 = arith.constant 0 : index
    %c0_15 = arith.constant 0 : index
    %31 = vector.load %arg5[%c0_13, %c0_14, %c0_15] : memref<3x8x128xf32, #tpu.memory_space<vmem>>, vector<1x8x128xf32>
    %32 = vector.shape_cast %31 : vector<1x8x128xf32> to vector<8x128xf32>
    %33 = vector.shape_cast %26 : vector<8x128xf32> to vector<1x8x128xf32>
    %cst_16 = arith.constant dense<0.000000e+00> : vector<8x128xf32>
    %34 = vector.multi_reduction <add>, %33, %cst_16 [0] : vector<1x8x128xf32> to vector<8x128xf32>
    %35 = arith.addf %32, %34 : vector<8x128xf32>
    %c0_17 = arith.constant 0 : index
    %c0_18 = arith.constant 0 : index
    %c0_19 = arith.constant 0 : index
    %36 = vector.load %arg5[%c0_17, %c0_18, %c0_19] : memref<3x8x128xf32, #tpu.memory_space<vmem>>, vector<1x8x128xf32>
    %37 = vector.shape_cast %36 : vector<1x8x128xf32> to vector<8x128xf32>
    %38 = vector.shape_cast %35 : vector<8x128xf32> to vector<1x8x128xf32>
    tpu.vector_store %arg5[%c0_17, %c0_18, %c0_19], %38 {strides = array<i32>} : memref<3x8x128xf32, #tpu.memory_space<vmem>>, vector<1x8x128xf32>,
    %c1 = arith.constant 1 : index
    %c0_20 = arith.constant 0 : index
    %c0_21 = arith.constant 0 : index
    %39 = vector.load %arg5[%c1, %c0_20, %c0_21] : memref<3x8x128xf32, #tpu.memory_space<vmem>>, vector<1x8x128xf32>
    %40 = vector.shape_cast %39 : vector<1x8x128xf32> to vector<8x128xf32>
    %41 = vector.shape_cast %29 : vector<8x128xf32> to vector<1x8x128xf32>
    %cst_22 = arith.constant dense<0.000000e+00> : vector<8x128xf32>
    %42 = vector.multi_reduction <add>, %41, %cst_22 [0] : vector<1x8x128xf32> to vector<8x128xf32>
    %43 = arith.addf %40, %42 : vector<8x128xf32>
    %c1_23 = arith.constant 1 : index
    %c0_24 = arith.constant 0 : index
    %c0_25 = arith.constant 0 : index
    %44 = vector.load %arg5[%c1_23, %c0_24, %c0_25] : memref<3x8x128xf32, #tpu.memory_space<vmem>>, vector<1x8x128xf32>
    %45 = vector.shape_cast %44 : vector<1x8x128xf32> to vector<8x128xf32>
    %46 = vector.shape_cast %43 : vector<8x128xf32> to vector<1x8x128xf32>
    tpu.vector_store %arg5[%c1_23, %c0_24, %c0_25], %46 {strides = array<i32>} : memref<3x8x128xf32, #tpu.memory_space<vmem>>, vector<1x8x128xf32>,
    %c2 = arith.constant 2 : index
    %c0_26 = arith.constant 0 : index
    %c0_27 = arith.constant 0 : index
    %47 = vector.load %arg5[%c2, %c0_26, %c0_27] : memref<3x8x128xf32, #tpu.memory_space<vmem>>, vector<1x8x128xf32>
    %48 = vector.shape_cast %47 : vector<1x8x128xf32> to vector<8x128xf32>
    %49 = vector.shape_cast %30 : vector<8x128xf32> to vector<1x8x128xf32>
    %cst_28 = arith.constant dense<0.000000e+00> : vector<8x128xf32>
    %50 = vector.multi_reduction <add>, %49, %cst_28 [0] : vector<1x8x128xf32> to vector<8x128xf32>
    %51 = arith.addf %48, %50 : vector<8x128xf32>
    %c2_29 = arith.constant 2 : index
    %c0_30 = arith.constant 0 : index
    %c0_31 = arith.constant 0 : index
    %52 = vector.load %arg5[%c2_29, %c0_30, %c0_31] : memref<3x8x128xf32, #tpu.memory_space<vmem>>, vector<1x8x128xf32>
    %53 = vector.shape_cast %52 : vector<1x8x128xf32> to vector<8x128xf32>
    %54 = vector.shape_cast %51 : vector<8x128xf32> to vector<1x8x128xf32>
    tpu.vector_store %arg5[%c2_29, %c0_30, %c0_31], %54 {strides = array<i32>} : memref<3x8x128xf32, #tpu.memory_space<vmem>>, vector<1x8x128xf32>,
    %c0_i32_32 = arith.constant 0 : i32
    %55 = arith.cmpi eq, %arg1, %c0_i32_32 : i32
    %56 = arith.extui %55 : i1 to i32
    %c0_i32_33 = arith.constant 0 : i32
    %57 = arith.cmpi ne, %56, %c0_i32_33 : i32
    scf.if %57 {
      %c0_34 = arith.constant 0 : index
      %c0_35 = arith.constant 0 : index
      %c0_36 = arith.constant 0 : index
      %58 = vector.load %arg5[%c0_34, %c0_35, %c0_36] : memref<3x8x128xf32, #tpu.memory_space<vmem>>, vector<3x8x128xf32>
      %c0_37 = arith.constant 0 : index
      %c0_38 = arith.constant 0 : index
      %c0_39 = arith.constant 0 : index
      %c0_40 = arith.constant 0 : index
      %59 = vector.load %arg4[%c0_37, %c0_38, %c0_39, %c0_40] : memref<1x3x8x128xf32, #tpu.memory_space<vmem>>, vector<1x3x8x128xf32>
      %60 = vector.shape_cast %59 : vector<1x3x8x128xf32> to vector<3x8x128xf32>
      %61 = vector.shape_cast %58 : vector<3x8x128xf32> to vector<1x3x8x128xf32>
      tpu.vector_store %arg4[%c0_37, %c0_38, %c0_39, %c0_40], %61 {strides = array<i32>} : memref<1x3x8x128xf32, #tpu.memory_space<vmem>>, vector<1x3x8x128xf32>,
    } else {
    }
    return
  }
  func.func @transform_0(%arg0: i32, %arg1: i32) -> (i32, i32, i32) {
    %c0_i32 = arith.constant 0 : i32
    %c0_i32_0 = arith.constant 0 : i32
    return %arg0, %arg1, %c0_i32 : i32, i32, i32
  }
  func.func @transform_1(%arg0: i32, %arg1: i32) -> (i32, i32, i32) {
    %c0_i32 = arith.constant 0 : i32
    %c0_i32_0 = arith.constant 0 : i32
    return %arg0, %arg1, %c0_i32 : i32, i32, i32
  }
  func.func @transform_2(%arg0: i32, %arg1: i32) -> (i32, i32, i32, i32) {
    %c0_i32 = arith.constant 0 : i32
    %c0_i32_0 = arith.constant 0 : i32
    %c0_i32_1 = arith.constant 0 : i32
    %c0_i32_2 = arith.constant 0 : i32
    return %arg0, %c0_i32, %c0_i32_0, %c0_i32_1 : i32, i32, i32, i32
  }
}

</mosaic_0001>

<bundles_post_ra>
// kernel: tpu_custom_call.1
= control target key start
LH: loop header
LB: loop body
LE: loop exit
PB: predicated region body
PF: predicated region fallthrough
CT: control target
= control target key end

     0   :  { %7 = vsyncpa [#allocation4], 0  ;;  %s792_s0 = inlined_call_operand.hbm [shape: f32[2,8,128], index: 0, kind: input, shape index: {}]   ;;  %s793_s1 = inlined_call_operand.hbm [shape: f32[2,8,128], index: 1, kind: input, shape index: {}]   ;;  %s794_s2 = inlined_call_operand.hbm [shape: f32[2,3,8,128], index: 2, kind: output, shape index: {}]  }
   0x1   :  { %9 = vsyncpa [#allocation4 + $0x1], 0 }
   0x2   :  { %10 = vsyncpa [#allocation7], 0 }
   0x3   :  { %12 = vsyncpa [#allocation7 + $0x1], 0 }
   0x4   :  { %13 = vsyncpa [#allocation5], 0 }
   0x5   :  { %15 = vsyncpa [#allocation5 + $0x1], 0  ;;  %s663_s9 = smov 0   ;;  %s665_s10 = smov 0  }
   0x6   :  { %s667_s11 = smov 0   ;;  %s669_s12 = smov 0  }
   0x7   :  { %s671_s13 = smov 0   ;;  %s673_s14 = smov 0  }
   0x8 LB: > { %s405_s15 = sadd.s32 4294967295, %s644_s14   ;;  %s406_s16 = sadd.s32 4294967294, %s644_s14   ;;  %s644_s14 = sphi %s673_s14, %s21_s14   ;;  %s640_s13 = sphi %s671_s13, %s803_s13   ;;  %s636_s12 = sphi %s669_s12, %s802_s12   ;;  %s632_s11 = sphi %s667_s11, %s801_s11   ;;  %s628_s10 = sphi %s665_s10, %s800_s10   ;;  %s624_s9 = sphi %s663_s9, %s799_s9  }
   0x9   : > { %s33_s17 = sadd.s32 1, %s640_s13  ;;  %s42_s18 = sadd.s32 1, %s632_s11 }
   0xa   : > { %p35_p0 = scmp.ge.s32.totalorder %s33_s17, 2  ;;  %p49_p1 = scmp.ne.s32.totalorder %s632_s11, %s628_s10 }
   0xb   : > { %p50_p2 = scmp.eq.s32.totalorder %s644_s14, 0  ;;  %p55_p3 = scmp.ne.s32.totalorder %s628_s10, %s624_s9 }
   0xc   : > { %s805_s17 = smov (%p35_p0, %s33_s17), 0  ;;  %p56_p5 = scmp.eq.s32.totalorder %s405_s15, 0 }
   0xd   : > { %p704_p4 = por %p50_p2, %p49_p1  ;;  %s37_s20 = ssub.s32 %s640_s13, %s805_s17 }
   0xe   : > { %p107_p6 = scmp.eq.s32.totalorder %s405_s15, 1  ;;  %p40_p7 = scmp.eq.s32.totalorder %s37_s20, 0 }
   0xf   : > { %p710_p8 = por %p56_p5, %p55_p3  ;;  %p113_p10 = scmp.eq.s32.totalorder %s406_s16, 1 }
  0x10   : > { %p714_p9 = por %p107_p6, %p49_p1  ;;  %p408_p12 = scmp.ge.s32.totalorder %s644_s14, 2 }
  0x11   : > { %s719_s23 = scalar_select %p40_p7, %s632_s11, %s42_s18  }
  0x12   : > { %p721_p11 = por %p113_p10, %p55_p3  ;;  %p438_p13 = scmp.lt.s32.totalorder %s644_s14, 2 }
  0x13   : > { %s133_s25 = sand.u32 1, %s632_s11   ;;  %s410_s27 = sshll.u32 %s640_s13, 3 }
  0x14   : > { %s409_s26 = sshll.u32 %s133_s25, 3  ;;  %s142_s30 = scalar_lea.hbm %s792_s0, %s410_s27 }
  0x15   : > { %s137_s3 = scalar_lea.vmem [#allocation3], %s409_s26  ;;  %s144_s5 = sshll.u32 %s142_s30, 4  ;;  %s145_s5 = int_to_ptr.hbm [resolvable:$true] %s144_s5 }
  0x16   : > { %s146_s4 = sshll.u32 %s137_s3, 4  ;;  %p428_p0 = pnand %p438_p13, %p704_p4  ;;  %s147_s4 = int_to_ptr.vmem [resolvable:$true] %s146_s4 }
  0x17   : > { %p413_p1 = scmp.ge.s32.totalorder %s644_s14, 1  ;;  %p171_p2 = scmp.lt.s32.totalorder %s644_s14, 3 }
  0x18   : > { %s134_s6 = scalar_lea.sflag [#allocation4], %s133_s25  ;;  %s162_s15 = scalar_lea.hbm %s793_s1, %s410_s27 }
  0x19   : > { %430 = dma.hbm_to_vmem [thread:$0]  (!%p428_p0), %s145_s5, 128, %s147_s4, %s134_s6  }
  0x1a   : > { %p172_p3 = pnand %p413_p1, %p171_p2  ;;  %s157_s16 = scalar_lea.vmem [#allocation6], %s409_s26 }
  0x1b   : > { %s166_s18 = sshll.u32 %s157_s16, 4  ;;  %s164_s20 = sshll.u32 %s162_s15, 4  ;;  %s167_s18 = int_to_ptr.vmem [resolvable:$true] %s166_s18  ;;  %s165_s20 = int_to_ptr.hbm [resolvable:$true] %s164_s20 }
  0x1c   : > { %s154_s28 = scalar_lea.sflag [#allocation7], %s133_s25  ;;  %175 = sbr.rel (%p172_p3) target bundleno = 92 (0x5c), region = 28 }
  0x1d   : > { %433 = dma.hbm_to_vmem [thread:$0]  (!%p428_p0), %s165_s20, 128, %s167_s18, %s154_s28  }
  0x1e   : > { %s740_s19 = sand.u32 (!%p172_p3), 1, %s628_s10  }
  0x1f   : > { %s414_s29 = sshll.u32 (!%p172_p3), %s740_s19, 3  ;;  %s178_s30 = scalar_lea.sflag (!%p172_p3), [#allocation4], %s740_s19 }
  0x20   : > { %s181_s3 = scalar_lea.vmem (!%p172_p3), [#allocation3], %s414_s29 }
  0x21   : > { %611 = dma.done.wait (%p710_p8), %s178_s30, 128  }
  0x22   : > { %613 = vsyncadd (%p710_p8), %s178_s30, 4294967168  ;;  %s188_s26 = scalar_lea.sflag [#allocation7], %s740_s19  ;;  %s191_s25 = scalar_lea.vmem [#allocation6], %s414_s29 }
  0x23   : > { %615 = dma.done.wait (%p710_p8), %s188_s26, 128  }
  0x24   : > { %617 = vsyncadd (%p710_p8), %s188_s26, 4294967168  ;;  %v225_v0 = vld [vmem:[%s181_s3] sm:$0xff]  ;;  %s419_s27 = smul.u32 24, %s740_s19  ;;  %v226_v11 = vld [vmem:[%s191_s25] sm:$0xff]  ;;  %s284_s16 = scalar_lea.sflag [#allocation5], %s740_s19 }
  0x25   : > { %v227_v1 = vsub.f32 0.0, %v225_v0  ;;  %v257_v14 = vmax.f32 %v226_v11, 0.0  ;;  %s420_s4 = smul.u32 24, %s636_s12  ;;  %s578_s29 = scalar_lea.hbm %s794_s2, 48 }
  0x26   : > { %s217_s21 = scalar_lea.vmem [#allocation8], %s419_s27 }
  0x27   : > { %v228_v2 = vmul.f32 1.442695, %v227_v1  ;;  %s295_s7 = scalar_lea.hbm %s794_s2, %s420_s4  ;;  %s296_s8 = sshll.u32 %s217_s21, 4  ;;  %s297_s8 = int_to_ptr.vmem [resolvable:$true] %s296_s8 }
  0x28   : > { %s298_s15 = sshll.u32 %s295_s7, 4  ;;  %s299_s15 = int_to_ptr.hbm [resolvable:$true] %s298_s15 }
  0x29   : > { %490 = vpow2.f32 %v228_v2  ;;  %s572_s18 = sshra.s32 %s299_s15, 4  ;;  %s573_s18 = int_to_ptr.hbm [resolvable:$true] %s572_s18 }
  0x2a   : > { %s574_s12 = scalar_lea.hbm %s573_s18, 24  ;;  %p579_p7 = scmp.lt.s32.totalorder %s573_s18, %s794_s2 }
  0x2b   : > { %p575_p4 = scmp.ne.s32.totalorder %s573_s18, %s574_s12  ;;  %p580_p8 = scmp.lt.s32.totalorder %s578_s29, %s574_s12 }
  0x2d   : > { %p576_p5 = pnand %p575_p4, %p714_p9  ;;  %p581_p10 = por %p580_p8, %p579_p7 }
  0x2f   : > { %v491_v3 = vpop.eup %490  ;;  %p577_p6 = pneg %p576_p5 }
  0x30   : > { %v230_v4 = vadd.f32 1.0, %v491_v3 }
  0x31   : > { %p582_p13 = pnand %p581_p10, %p577_p6 }
  0x32   : > { %492 = vrcp.f32 %v230_v4  ;;  %v242_v7 = vand.u32 2147483648, %v230_v4  ;;  %vm236_vm0 = vweird.f32 %v230_v4  ;;  %v240_v9 = vand.u32 2147483647, %v230_v4 }
  0x34   : > { %v243_v12 = vor.u32 1.1754944e-38, %v242_v7  ;;  %vm241_vm3 = vcmp.eq.f32.partialorder %v240_v9, 8.507059e+37 }
  0x38   : > { %v493_v5 = vpop.eup %492 }
  0x39   : > { %v232_v6 = vmul.f32 %v493_v5, %v230_v4  ;;  %vm237_vm1 = vweird.f32 %v493_v5 }
  0x3a   : > { %vm238_vm2 = vmor %vm236_vm0, %vm237_vm1 }
  0x3b   : > { %v233_v8 = vsub.f32 1.0, %v232_v6 }
  0x3d   : > { %v234_v10 = vmul.f32 %v493_v5, %v233_v8 }
  0x3f   : > { %v235_v13 = vadd.f32 %v493_v5, %v234_v10 }
  0x41   : > { %v239_v15 = vsel %vm238_vm2, %v493_v5, %v235_v13 }
  0x42   : > { %v244_v16 = vsel %vm241_vm3, %v243_v12, %v239_v15 }
  0x43   : > { %v246_v17 = vmax.f32 %v244_v16, 1e-08  ;;  %v249_v18 = vsub.f32 1.0, %v244_v16  ;;  %v258_v19 = vmul.f32 %v257_v14, %v244_v16  ;;  %v259_v20 = vadd.f32 %v257_v14, %v244_v16 }
  0x45   : > { %494 = vlog2.f32 %v246_v17  ;;  %v250_v21 = vmax.f32 %v249_v18, 1e-08  ;;  %281 = vst [vmem:[%s217_s21 + $0x8] sm:$0xff] %v258_v19 }
  0x46   : > { %282 = vst [vmem:[%s217_s21 + $0x10] sm:$0xff] %v259_v20 }
  0x47   : > { %496 = vlog2.f32 %v250_v21 }
  0x4b   : > { %v495_v22 = vpop.eup %494 }
  0x4c   : > { %v248_v23 = vmul.f32 0.6931472, %v495_v22 }
  0x4d   : > { %v497_v24 = vpop.eup %496 }
  0x4e   : > { %v252_v25 = vmul.f32 0.6931472, %v497_v24 }
  0x50   : > { %v253_v26 = vsub.f32 %v248_v23, %v252_v25 }
  0x52   : > { %v254_v27 = vmul.f32 %v253_v26, %v226_v11 }
  0x54   : > { %v255_v28 = vadd.f32 %v254_v27, %v252_v25 }
  0x56   : > { %v256_v29 = vsub.f32 0.0, %v255_v28 }
  0x58   : > { %280 = vst [vmem:[%s217_s21] sm:$0xff] %v256_v29 }
  0x59   : > { %585 = shalt.err (!%p582_p13)
}
  0x5a   : > { %s646_s19 = smov 128   ;;  %s647_s26 = smov 8  }
  0x5b   : > { %425 = dma.vmem_to_hbm [thread:$0]  (%p714_p9), %s297_s8, 384, %s299_s15, %s284_s16, %s646_s19, %s646_s19, %s647_s26  }
  0x5c PF: > { %s313_s25 = sand.u32 1, %s624_s9   ;;  %p435_p0 = pnand %p408_p12, %p721_p11 }
  0x5d   : > { %s314_s27 = scalar_lea.sflag [#allocation5], %s313_s25 }
  0x5e   : > { %p436_p1 = pneg %p435_p0 }
  0x60   : > { %619 = dma.done.wait (%p436_p1), %s314_s27, 384  }
  0x61   : > { %621 = vsyncadd (%p436_p1), %s314_s27, 4294966912  ;;  %s21_s14 = sadd.s32 1, %s644_s14   ;;  %s799_s9 = smov %s628_s10 }
  0x62   : > { %p18_p2 = scmp.ge.s32.totalorder %s21_s14, 4   ;;  %s800_s10 = smov %s632_s11 }
  0x63   : > { %s801_s11 = smov %s719_s23  ;;  %s802_s12 = smov %s640_s13 }
  0x64   : > { %s803_s13 = smov %s805_s17  ;;  %20 = sbr.rel (!%p18_p2) target bundleno = 8 (0x8), region = 96 }
  0x69   :  { %320 = vsyncpa [#allocation4], 1 }
  0x6a   :  { %322 = vsyncpa [#allocation4 + $0x1], 1 }
  0x6b   :  { %323 = vsyncpa [#allocation7], 1 }
  0x6c   :  { %325 = vsyncpa [#allocation7 + $0x1], 1 }
  0x6d   :  { %326 = vsyncpa [#allocation5], 1 }
  0x6e   :  { %328 = vsyncpa [#allocation5 + $0x1], 1 }

</bundles_post_ra>
